<compile_context>
chip_gen: v5e
topology: v5e:2x2
jax: 0.10.0
libtpu: 0.0.40
codegen_flags: <defaults>
</compile_context>

<pallas_src>
import functools
import math

import jax
import jax.numpy as jnp
from jax.experimental import pallas as pl
from jax.experimental.pallas import tpu as pltpu

_LANE = 128
_SUBLANE = 8


def _round_up(x: int, m: int) -> int:
    return ((x + m - 1) // m) * m


def _cdiv(a: int, b: int) -> int:
    return -(-a // b)


def _vmem_budget_bytes() -> int:
    """~80% of per-core VMEM (v5e/v6e: 128 MiB, v7x: 64 MiB); safe fallback."""
    cap = 64 * 1024 * 1024
    try:
        info = pltpu.get_tpu_info()
        cap = int(getattr(info, "vmem_capacity_bytes", cap)) or cap
    except Exception:
        pass
    return (cap * 4) // 5


def _sigmoid(z, approx: bool):
    if approx:
        # EUP relief: approx reciprocal replaces the divide inside sigmoid.
        # TODO(synk): on v6e/v7x the exp could additionally run in bf16 to
        # further halve EUP pushes (v5e has no bf16 EUP, so keep f32 here).
        return pl.reciprocal(1.0 + jnp.exp(-z), approx=True)
    return jax.nn.sigmoid(z)


def _layer_step(h, w, b, d_pad: int, approx: bool):
    """One highway layer on an f32 h. w is the packed [gate | nonlinear] slab."""
    pre = jnp.dot(h.astype(w.dtype), w, preferred_element_type=jnp.float32)
    pre = pre + b.astype(jnp.float32)
    gate = _sigmoid(pre[:, :d_pad], approx)
    nonlin = jnp.maximum(pre[:, d_pad:], 0.0)           # ReLU
    return h + gate * (nonlin - h)                      # == g*nl + (1-g)*h


def _highway_resident_kernel(x_ref, wgn_ref, bgn_ref, wf_ref, bf_ref, o_ref, *,
                             n_layers: int, d_pad: int, approx_sigmoid: bool,
                             unroll_layers: bool):
    """All layer weights resident in VMEM; one row tile per grid step."""
    h = x_ref[...].astype(jnp.float32)          # h carried in f32 across layers

    def body(l, h):
        return _layer_step(h, wgn_ref[l], bgn_ref[l], d_pad, approx_sigmoid)

    if unroll_layers:
        for l in range(n_layers):               # short static stack: unroll
            h = body(l, h)
    else:
        # Deep stacks: fori_loop bounds the live range of per-layer temporaries.
        h = jax.lax.fori_loop(0, n_layers, body, h)

    out = jnp.dot(h.astype(wf_ref.dtype), wf_ref[...],
                  preferred_element_type=jnp.float32)
    out = out + bf_ref[...].astype(jnp.float32)
    o_ref[...] = out.astype(o_ref.dtype)


def _highway_stream_kernel(x_ref, wgn_ref, bgn_ref, wf_ref, bf_ref, o_ref,
                           h_ref, *, d_pad: int, approx_sigmoid: bool):
    """Per-layer weight streaming (v7x-friendly): grid = (row_tiles, n_layers)."""
    l = pl.program_id(1)

    @pl.when(l == 0)
    def _():
        h_ref[...] = x_ref[...].astype(jnp.float32)

    h = _layer_step(h_ref[...], wgn_ref[0], bgn_ref[0], d_pad, approx_sigmoid)
    h_ref[...] = h

    @pl.when(l == pl.num_programs(1) - 1)
    def _():
        out = jnp.dot(h.astype(wf_ref.dtype), wf_ref[...],
                      preferred_element_type=jnp.float32)
        out = out + bf_ref[...].astype(jnp.float32)
        o_ref[...] = out.astype(o_ref.dtype)


def highway_network(x, params, *, tile_rows: int = 1024,
                    allow_bf16_matmul: bool = True,
                    approx_sigmoid=None, stream_layers=None):
    """Apply the highway network to x of shape (..., input_dim)."""
    wn, bn, wg, bg, wf, bf = (params["wn"], params["bn"], params["wg"],
                              params["bg"], params["wf"], params["bf"])
    n_layers, d_in, _ = wn.shape
    d_out = wf.shape[1]
    assert x.shape[-1] == d_in

    dtype = x.dtype
    # bf16 is the MXU fast path on v5e/v6e/v7x (no fast f32 path); accumulation
    # stays f32 via preferred_element_type, and h is carried in f32.
    matmul_dtype = (jnp.bfloat16 if (allow_bf16_matmul or dtype == jnp.bfloat16)
                    else dtype)
    if approx_sigmoid is None:
        approx_sigmoid = matmul_dtype == jnp.bfloat16

    d_pad = _round_up(d_in, _LANE)
    o_pad = _round_up(d_out, _LANE)

    # ---- wrapper-side weight packing & lane padding (exact: zero padding) ----
    wg_p = jnp.pad(wg, ((0, 0), (0, d_pad - d_in), (0, d_pad - d_in)))
    wn_p = jnp.pad(wn, ((0, 0), (0, d_pad - d_in), (0, d_pad - d_in)))
    wgn = jnp.concatenate([wg_p, wn_p], axis=-1).astype(matmul_dtype)  # (L,Dp,2Dp)
    bg_p = jnp.pad(bg, ((0, 0), (0, 0), (0, d_pad - d_in)))
    bn_p = jnp.pad(bn, ((0, 0), (0, 0), (0, d_pad - d_in)))
    bgn = jnp.concatenate([bg_p, bn_p], axis=-1).astype(jnp.float32)   # (L,1,2Dp)
    wf_p = jnp.pad(wf, ((0, d_pad - d_in), (0, o_pad - d_out))).astype(matmul_dtype)
    bf_p = jnp.pad(bf, ((0, 0), (0, o_pad - d_out))).astype(jnp.float32)

    # ---- corrected, chip-aware VMEM accounting --------------------------------
    budget = _vmem_budget_bytes()
    w_item = jnp.dtype(matmul_dtype).itemsize
    x_item = jnp.dtype(dtype).itemsize

    layer_w_bytes = d_pad * 2 * d_pad * w_item + 2 * d_pad * 4
    final_w_bytes = d_pad * o_pad * w_item + o_pad * 4
    resident_w_bytes = n_layers * layer_w_bytes + final_w_bytes    # Buffered(1)
    streamed_w_bytes = 2 * layer_w_bytes + final_w_bytes           # 2-deep layer slab
    if stream_layers is None:
        # Stream per-layer weights when the resident stack would eat more than
        # half the per-core budget (leaves room for activations/temps) — v7x 64 MiB.
        stream_layers = n_layers > 1 and resident_w_bytes > budget // 2
    weight_bytes = streamed_w_bytes if stream_layers else resident_w_bytes

    # Per-row bytes: x tile (<=3 buffers) + out tile (2 buffers) + f32 in-kernel
    # temporaries (pre 2Dp + gate/nonlin/h Dp each + out Op) + h scratch (stream).
    per_row = (3 * d_pad * x_item + 2 * o_pad * x_item
               + (6 * d_pad + o_pad) * 4
               + (4 * d_pad if stream_layers else 0))

    # ---- row tiling: largest tile that fits, even split, >= 2 grid steps ------
    lead_shape = x.shape[:-1]
    m = math.prod(lead_shape) if lead_shape else 1
    avail = max(budget - weight_bytes - (2 << 20), per_row * _SUBLANE)
    tm_cap = max(_SUBLANE,
                 min(int(tile_rows), (avail // per_row) // _SUBLANE * _SUBLANE))
    n_steps = max(2, _cdiv(m, tm_cap))    # >= 2 so "parallel" spans both v7x TCs
    tm = _round_up(_cdiv(m, n_steps), _SUBLANE)
    while tm > tm_cap:                    # safety net; normally never taken
        n_steps += 1
        tm = _round_up(_cdiv(m, n_steps), _SUBLANE)
    m_pad = n_steps * tm

    x2d = x.reshape(m, d_in)
    x2d = jnp.pad(x2d, ((0, m_pad - m), (0, d_pad - d_in)))

    need = weight_bytes + tm * per_row
    vmem_limit = int(min(budget, max(need * 3 // 2, 32 * 1024 * 1024)))

    out_shape = jax.ShapeDtypeStruct((m_pad, o_pad), dtype)
    resident = pl.Buffered(1)             # constant index_map -> never re-DMA'd

    if not stream_layers:
        kernel = functools.partial(
            _highway_resident_kernel, n_layers=n_layers, d_pad=d_pad,
            approx_sigmoid=approx_sigmoid, unroll_layers=n_layers < 6)
        x_kwargs = {}
        if d_pad <= 256 and n_steps >= 3:
            # Small-D regime: deepen x buffering to hide its DMA behind the
            # short per-tile compute (weights are resident; only x/out stream).
            x_kwargs["pipeline_mode"] = pl.Buffered(3)
        grid_spec = pltpu.PrefetchScalarGridSpec(
            num_scalar_prefetch=0,
            grid=(n_steps,),
            in_specs=[
                pl.BlockSpec((tm, d_pad), lambda i: (i, 0), **x_kwargs),
                pl.BlockSpec((n_layers, d_pad, 2 * d_pad), lambda i: (0, 0, 0),
                             pipeline_mode=resident),
                pl.BlockSpec((n_layers, 1, 2 * d_pad), lambda i: (0, 0, 0),
                             pipeline_mode=resident),
                pl.BlockSpec((d_pad, o_pad), lambda i: (0, 0),
                             pipeline_mode=resident),
                pl.BlockSpec((1, o_pad), lambda i: (0, 0),
                             pipeline_mode=resident),
            ],
            out_specs=pl.BlockSpec((tm, o_pad), lambda i: (i, 0)),
        )
        dims = ("parallel",)
    else:
        kernel = functools.partial(
            _highway_stream_kernel, d_pad=d_pad, approx_sigmoid=approx_sigmoid)
        grid_spec = pltpu.PrefetchScalarGridSpec(
            num_scalar_prefetch=0,
            grid=(n_steps, n_layers),        # layer axis innermost / sequential
            in_specs=[
                pl.BlockSpec((tm, d_pad), lambda i, l: (i, 0)),
                pl.BlockSpec((1, d_pad, 2 * d_pad), lambda i, l: (l, 0, 0)),
                pl.BlockSpec((1, 1, 2 * d_pad), lambda i, l: (l, 0, 0)),
                pl.BlockSpec((d_pad, o_pad), lambda i, l: (0, 0),
                             pipeline_mode=resident),
                pl.BlockSpec((1, o_pad), lambda i, l: (0, 0),
                             pipeline_mode=resident),
            ],
            out_specs=pl.BlockSpec((tm, o_pad), lambda i, l: (i, 0)),
            scratch_shapes=[pltpu.VMEM((tm, d_pad), jnp.float32)],
        )
        dims = ("parallel", "arbitrary")

    out2d = pl.pallas_call(
        kernel,
        out_shape=out_shape,
        grid_spec=grid_spec,
        compiler_params=pltpu.CompilerParams(
            dimension_semantics=dims, vmem_limit_bytes=vmem_limit),
    )(x2d, wgn, bgn, wf_p, bf_p)

    out = out2d[:m, :d_out]
    return out.reshape(*lead_shape, d_out)


def init_highway_params(key, input_dim: int, output_dim: int, n_layers: int,
                        dtype=jnp.float32):
    """Mirror nn.Linear default init U(-1/sqrt(in), 1/sqrt(in)); gate bias = 0."""
    keys = jax.random.split(key, 3 * n_layers + 2)
    bound = 1.0 / math.sqrt(input_dim)

    def u(k, shape):
        return jax.random.uniform(k, shape, jnp.float32,
                                  minval=-bound, maxval=bound).astype(dtype)

    wn = jnp.stack([u(keys[3 * i + 0], (input_dim, input_dim))
                    for i in range(n_layers)])
    bn = jnp.stack([u(keys[3 * i + 1], (1, input_dim))
                    for i in range(n_layers)])
    wg = jnp.stack([u(keys[3 * i + 2], (input_dim, input_dim))
                    for i in range(n_layers)])
    bg = jnp.zeros((n_layers, 1, input_dim), dtype)   # gate bias forced to 0.0
    wf = u(keys[-2], (input_dim, output_dim))
    bf = u(keys[-1], (1, output_dim))
    return {"wn": wn, "bn": bn, "wg": wg, "bg": bg, "wf": wf, "bf": bf}


def highway_network_ref(x, params):
    """Pure-JAX reference (unpadded, unpacked, f32) for correctness checking."""
    wn, bn, wg, bg, wf, bf = (params["wn"], params["bn"], params["wg"],
                              params["bg"], params["wf"], params["bf"])
    h = x.astype(jnp.float32)
    for l in range(wn.shape[0]):
        gate = jax.nn.sigmoid(h @ wg[l].astype(jnp.float32) + bg[l])
        nonlin = jnp.maximum(h @ wn[l].astype(jnp.float32) + bn[l], 0.0)
        h = gate * nonlin + (1.0 - gate) * h
    return (h @ wf.astype(jnp.float32) + bf[0]).astype(x.dtype)


if __name__ == "__main__":
    # Small shapes: batch=2, seq=8, input_dim=32, output_dim=16, n_layers=3.
    input_dim, output_dim, n_layers = 32, 16, 3
    batch, seq = 2, 8

    key = jax.random.PRNGKey(0)
    pkey, xkey = jax.random.split(key)
    params = init_highway_params(pkey, input_dim, output_dim, n_layers)
    x = jax.random.normal(xkey, (batch, seq, input_dim), jnp.float32)

    ref = highway_network_ref(x.reshape(-1, input_dim), params).reshape(
        batch, seq, output_dim)

    # 1) Exact f32 path, resident weights -> tight tolerance.
    out_exact = jax.block_until_ready(
        highway_network(x, params, allow_bf16_matmul=False))
    assert out_exact.shape == (batch, seq, output_dim)
    assert jnp.allclose(out_exact, ref, atol=1e-4, rtol=1e-4), "exact path mismatch"

    # 2) Fast default path: bf16 MXU operands + approx-reciprocal sigmoid.
    out_fast = jax.block_until_ready(highway_network(x, params))
    assert jnp.allclose(out_fast, ref, atol=1e-1, rtol=5e-2), "fast path mismatch"

    # 3) Forced per-layer weight streaming (v7x-style path), exact math.
    out_stream = jax.block_until_ready(
        highway_network(x, params, allow_bf16_matmul=False, stream_layers=True))
    assert jnp.allclose(out_stream, ref, atol=1e-4, rtol=1e-4), "stream path mismatch"

    # 4) Deep stack -> fori_loop layer path, exact math.
    params7 = init_highway_params(jax.random.PRNGKey(1), input_dim, output_dim, 7)
    ref7 = highway_network_ref(x.reshape(-1, input_dim), params7).reshape(
        batch, seq, output_dim)
    out7 = jax.block_until_ready(
        highway_network(x, params7, allow_bf16_matmul=False))
    assert jnp.allclose(out7, ref7, atol=1e-4, rtol=1e-4), "deep-stack mismatch"

    print("KERNEL_OK")
</pallas_src>

<mosaic_0001>
module attributes {stable_mosaic.version = 11 : i64} {
  func.func @_highway_resident_kernel(%arg0: i32, %arg1: memref<8x128xf32, #tpu.memory_space<vmem>>, %arg2: memref<3x128x256xf32, #tpu.memory_space<vmem>>, %arg3: memref<3x1x256xf32, #tpu.memory_space<vmem>>, %arg4: memref<128x128xf32, #tpu.memory_space<vmem>>, %arg5: memref<1x128xf32, #tpu.memory_space<vmem>>, %arg6: memref<8x128xf32, #tpu.memory_space<vmem>>) attributes {dimension_semantics = [#tpu.dimension_semantics<parallel>], iteration_bounds = array<i64: 2>, scalar_prefetch = 0 : i64, scratch_operands = 0 : i64, tpu.core_type = #tpu.core_type<tc>, window_params = [{transform_indices = @transform_0, window_bounds = array<i64: 8, 128>}, {pipeline_mode = #tpu.pipeline_mode<synchronous>, transform_indices = @transform_1, window_bounds = array<i64: 3, 128, 256>}, {pipeline_mode = #tpu.pipeline_mode<synchronous>, transform_indices = @transform_2, window_bounds = array<i64: 3, 1, 256>}, {pipeline_mode = #tpu.pipeline_mode<synchronous>, transform_indices = @transform_3, window_bounds = array<i64: 128, 128>}, {pipeline_mode = #tpu.pipeline_mode<synchronous>, transform_indices = @transform_4, window_bounds = array<i64: 1, 128>}, {transform_indices = @transform_5, window_bounds = array<i64: 8, 128>}]} {
    %c0 = arith.constant 0 : index
    %c0_0 = arith.constant 0 : index
    %0 = vector.load %arg1[%c0, %c0_0] : memref<8x128xf32, #tpu.memory_space<vmem>>, vector<8x128xf32>
    %c0_1 = arith.constant 0 : index
    %c0_2 = arith.constant 0 : index
    %c0_3 = arith.constant 0 : index
    %1 = vector.load %arg2[%c0_1, %c0_2, %c0_3] : memref<3x128x256xf32, #tpu.memory_space<vmem>>, vector<1x128x256xf32>
    %2 = vector.shape_cast %1 : vector<1x128x256xf32> to vector<128x256xf32>
    %c0_4 = arith.constant 0 : index
    %c0_5 = arith.constant 0 : index
    %c0_6 = arith.constant 0 : index
    %3 = vector.load %arg3[%c0_4, %c0_5, %c0_6] : memref<3x1x256xf32, #tpu.memory_space<vmem>>, vector<1x1x256xf32>
    %4 = vector.shape_cast %3 : vector<1x1x256xf32> to vector<1x256xf32>
    %cst = arith.constant dense<0.000000e+00> : vector<8x256xf32>
    %5 = tpu.matmul %0, %2, %cst {dimension_numbers = #tpu.dot_dimension_numbers<[1], [0], [0], [1], [0, 0, 1, 1], [], []>} : vector<8x128xf32>, vector<128x256xf32>, vector<8x256xf32> -> vector<8x256xf32>
    %6 = vector.broadcast %4 : vector<1x256xf32> to vector<8x256xf32>
    %7 = arith.addf %5, %6 : vector<8x256xf32>
    %8 = vector.extract_strided_slice %7 {offsets = [0, 0], sizes = [8, 128], strides = [1, 1]} : vector<8x256xf32> to vector<8x128xf32>
    %9 = arith.negf %8 : vector<8x128xf32>
    %10 = math.exp %9 : vector<8x128xf32>
    %cst_7 = arith.constant 1.000000e+00 : f32
    %11 = vector.broadcast %cst_7 : f32 to vector<8x128xf32>
    %12 = arith.addf %11, %10 : vector<8x128xf32>
    %13 = arith.divf %11, %12 : vector<8x128xf32>
    %14 = vector.extract_strided_slice %7 {offsets = [0, 128], sizes = [8, 128], strides = [1, 1]} : vector<8x256xf32> to vector<8x128xf32>
    %cst_8 = arith.constant 0.000000e+00 : f32
    %15 = vector.broadcast %cst_8 : f32 to vector<8x128xf32>
    %16 = arith.maximumf %14, %15 : vector<8x128xf32>
    %17 = arith.subf %16, %0 : vector<8x128xf32>
    %18 = arith.mulf %13, %17 : vector<8x128xf32>
    %19 = arith.addf %0, %18 : vector<8x128xf32>
    %c1 = arith.constant 1 : index
    %c0_9 = arith.constant 0 : index
    %c0_10 = arith.constant 0 : index
    %20 = vector.load %arg2[%c1, %c0_9, %c0_10] : memref<3x128x256xf32, #tpu.memory_space<vmem>>, vector<1x128x256xf32>
    %21 = vector.shape_cast %20 : vector<1x128x256xf32> to vector<128x256xf32>
    %c1_11 = arith.constant 1 : index
    %c0_12 = arith.constant 0 : index
    %c0_13 = arith.constant 0 : index
    %22 = vector.load %arg3[%c1_11, %c0_12, %c0_13] : memref<3x1x256xf32, #tpu.memory_space<vmem>>, vector<1x1x256xf32>
    %23 = vector.shape_cast %22 : vector<1x1x256xf32> to vector<1x256xf32>
    %cst_14 = arith.constant dense<0.000000e+00> : vector<8x256xf32>
    %24 = tpu.matmul %19, %21, %cst_14 {dimension_numbers = #tpu.dot_dimension_numbers<[1], [0], [0], [1], [0, 0, 1, 1], [], []>} : vector<8x128xf32>, vector<128x256xf32>, vector<8x256xf32> -> vector<8x256xf32>
    %25 = vector.broadcast %23 : vector<1x256xf32> to vector<8x256xf32>
    %26 = arith.addf %24, %25 : vector<8x256xf32>
    %27 = vector.extract_strided_slice %26 {offsets = [0, 0], sizes = [8, 128], strides = [1, 1]} : vector<8x256xf32> to vector<8x128xf32>
    %28 = arith.negf %27 : vector<8x128xf32>
    %29 = math.exp %28 : vector<8x128xf32>
    %cst_15 = arith.constant 1.000000e+00 : f32
    %30 = vector.broadcast %cst_15 : f32 to vector<8x128xf32>
    %31 = arith.addf %30, %29 : vector<8x128xf32>
    %32 = arith.divf %30, %31 : vector<8x128xf32>
    %33 = vector.extract_strided_slice %26 {offsets = [0, 128], sizes = [8, 128], strides = [1, 1]} : vector<8x256xf32> to vector<8x128xf32>
    %cst_16 = arith.constant 0.000000e+00 : f32
    %34 = vector.broadcast %cst_16 : f32 to vector<8x128xf32>
    %35 = arith.maximumf %33, %34 : vector<8x128xf32>
    %36 = arith.subf %35, %19 : vector<8x128xf32>
    %37 = arith.mulf %32, %36 : vector<8x128xf32>
    %38 = arith.addf %19, %37 : vector<8x128xf32>
    %c2 = arith.constant 2 : index
    %c0_17 = arith.constant 0 : index
    %c0_18 = arith.constant 0 : index
    %39 = vector.load %arg2[%c2, %c0_17, %c0_18] : memref<3x128x256xf32, #tpu.memory_space<vmem>>, vector<1x128x256xf32>
    %40 = vector.shape_cast %39 : vector<1x128x256xf32> to vector<128x256xf32>
    %c2_19 = arith.constant 2 : index
    %c0_20 = arith.constant 0 : index
    %c0_21 = arith.constant 0 : index
    %41 = vector.load %arg3[%c2_19, %c0_20, %c0_21] : memref<3x1x256xf32, #tpu.memory_space<vmem>>, vector<1x1x256xf32>
    %42 = vector.shape_cast %41 : vector<1x1x256xf32> to vector<1x256xf32>
    %cst_22 = arith.constant dense<0.000000e+00> : vector<8x256xf32>
    %43 = tpu.matmul %38, %40, %cst_22 {dimension_numbers = #tpu.dot_dimension_numbers<[1], [0], [0], [1], [0, 0, 1, 1], [], []>} : vector<8x128xf32>, vector<128x256xf32>, vector<8x256xf32> -> vector<8x256xf32>
    %44 = vector.broadcast %42 : vector<1x256xf32> to vector<8x256xf32>
    %45 = arith.addf %43, %44 : vector<8x256xf32>
    %46 = vector.extract_strided_slice %45 {offsets = [0, 0], sizes = [8, 128], strides = [1, 1]} : vector<8x256xf32> to vector<8x128xf32>
    %47 = arith.negf %46 : vector<8x128xf32>
    %48 = math.exp %47 : vector<8x128xf32>
    %cst_23 = arith.constant 1.000000e+00 : f32
    %49 = vector.broadcast %cst_23 : f32 to vector<8x128xf32>
    %50 = arith.addf %49, %48 : vector<8x128xf32>
    %51 = arith.divf %49, %50 : vector<8x128xf32>
    %52 = vector.extract_strided_slice %45 {offsets = [0, 128], sizes = [8, 128], strides = [1, 1]} : vector<8x256xf32> to vector<8x128xf32>
    %cst_24 = arith.constant 0.000000e+00 : f32
    %53 = vector.broadcast %cst_24 : f32 to vector<8x128xf32>
    %54 = arith.maximumf %52, %53 : vector<8x128xf32>
    %55 = arith.subf %54, %38 : vector<8x128xf32>
    %56 = arith.mulf %51, %55 : vector<8x128xf32>
    %57 = arith.addf %38, %56 : vector<8x128xf32>
    %c0_25 = arith.constant 0 : index
    %c0_26 = arith.constant 0 : index
    %58 = vector.load %arg4[%c0_25, %c0_26] : memref<128x128xf32, #tpu.memory_space<vmem>>, vector<128x128xf32>
    %cst_27 = arith.constant dense<0.000000e+00> : vector<8x128xf32>
    %59 = tpu.matmul %57, %58, %cst_27 {dimension_numbers = #tpu.dot_dimension_numbers<[1], [0], [0], [1], [0, 0, 1, 1], [], []>} : vector<8x128xf32>, vector<128x128xf32>, vector<8x128xf32> -> vector<8x128xf32>
    %c0_28 = arith.constant 0 : index
    %c0_29 = arith.constant 0 : index
    %60 = vector.load %arg5[%c0_28, %c0_29] : memref<1x128xf32, #tpu.memory_space<vmem>>, vector<1x128xf32>
    %61 = vector.broadcast %60 : vector<1x128xf32> to vector<8x128xf32>
    %62 = arith.addf %59, %61 : vector<8x128xf32>
    %c0_30 = arith.constant 0 : index
    %c0_31 = arith.constant 0 : index
    %63 = vector.load %arg6[%c0_30, %c0_31] : memref<8x128xf32, #tpu.memory_space<vmem>>, vector<8x128xf32>
    tpu.vector_store %arg6[%c0_30, %c0_31], %62 {strides = array<i32>} : memref<8x128xf32, #tpu.memory_space<vmem>>, vector<8x128xf32>,
    return
  }
  func.func @transform_0(%arg0: i32) -> (i32, i32) {
    %c0_i32 = arith.constant 0 : i32
    %c0_i32_0 = arith.constant 0 : i32
    return %arg0, %c0_i32 : i32, i32
  }
  func.func @transform_1(%arg0: i32) -> (i32, i32, i32) {
    %c0_i32 = arith.constant 0 : i32
    %c0_i32_0 = arith.constant 0 : i32
    %c0_i32_1 = arith.constant 0 : i32
    %c0_i32_2 = arith.constant 0 : i32
    return %c0_i32, %c0_i32_0, %c0_i32_1 : i32, i32, i32
  }
  func.func @transform_2(%arg0: i32) -> (i32, i32, i32) {
    %c0_i32 = arith.constant 0 : i32
    %c0_i32_0 = arith.constant 0 : i32
    %c0_i32_1 = arith.constant 0 : i32
    %c0_i32_2 = arith.constant 0 : i32
    return %c0_i32, %c0_i32_0, %c0_i32_1 : i32, i32, i32
  }
  func.func @transform_3(%arg0: i32) -> (i32, i32) {
    %c0_i32 = arith.constant 0 : i32
    %c0_i32_0 = arith.constant 0 : i32
    %c0_i32_1 = arith.constant 0 : i32
    return %c0_i32, %c0_i32_0 : i32, i32
  }
  func.func @transform_4(%arg0: i32) -> (i32, i32) {
    %c0_i32 = arith.constant 0 : i32
    %c0_i32_0 = arith.constant 0 : i32
    %c0_i32_1 = arith.constant 0 : i32
    return %c0_i32, %c0_i32_0 : i32, i32
  }
  func.func @transform_5(%arg0: i32) -> (i32, i32) {
    %c0_i32 = arith.constant 0 : i32
    %c0_i32_0 = arith.constant 0 : i32
    return %arg0, %c0_i32 : i32, i32
  }
}

</mosaic_0001>

<bundles_post_ra>
// kernel: tpu_custom_call.1
= control target key start
LH: loop header
LB: loop body
LE: loop exit
PB: predicated region body
PF: predicated region fallthrough
CT: control target
= control target key end

     0   :  { %10 = vsyncpa [#allocation3], 0  ;;  %s1292_s0 = inlined_call_operand.hbm [shape: f32[16,128], index: 0, kind: input, shape index: {}]   ;;  %s1293_s1 = inlined_call_operand.hbm [shape: f32[3,128,256], index: 1, kind: input, shape index: {}]   ;;  %s1294_s2 = inlined_call_operand.hbm [shape: f32[3,1,256], index: 2, kind: input, shape index: {}]   ;;  %s1295_s3 = inlined_call_operand.hbm [shape: f32[128,128], index: 3, kind: input, shape index: {}]   ;;  %s1296_s4 = inlined_call_operand.vmem [shape: f32[1,128], index: 4, kind: input, shape index: {}]   ;;  %s1297_s5 = inlined_call_operand.hbm [shape: f32[16,128], index: 5, kind: output, shape index: {}]  }
   0x1   :  { %12 = vsyncpa [#allocation3 + $0x1], 0 }
   0x2   :  { %13 = vsyncpa [#allocation6], 0 }
   0x3   :  { %14 = vsyncpa [#allocation9], 0 }
   0x4   :  { %15 = vsyncpa [#allocation4], 0 }
   0x5   :  { %17 = vsyncpa [#allocation4 + $0x1], 0  ;;  %s1108_s18 = smov 0   ;;  %s1110_s19 = smov 0  }
   0x6   :  { %s1112_s20 = smov 0   ;;  %s1114_s21 = smov 0  }
   0x7 LB: > { %s175_s24 = sshll.u32 %s1293_s1, 4  ;;  %s1132_s25 = sadd.s32 4294967295, %s1067_s21   ;;  %s1067_s21 = sphi %s1114_s21, %s1308_s21   ;;  %s1063_s20 = sphi %s1112_s20, %s1307_s20   ;;  %s1059_s19 = sphi %s1110_s19, %s1306_s19   ;;  %s1055_s18 = sphi %s1108_s18, %s1305_s18   ;;  %s176_s24 = int_to_ptr.hbm [resolvable:$true] %s175_s24 }
   0x8   : > { %p757_p0 = scmp.ge.s32.totalorder %s1067_s21, 1  ;;  %p44_p1 = scmp.eq.s32.totalorder %s1132_s25, 0 }
   0x9   : > { %p164_p2 = scmp.lt.s32.totalorder %s1067_s21, 3  ;;  %s1069_s27 = smov [#allocation5]  }
   0xa   : > { %s177_s28 = sshll.u32 %s1069_s27, 4  ;;  %s189_s6 = sshll.u32 %s1294_s2, 4  ;;  %s178_s28 = int_to_ptr.vmem [resolvable:$true] %s177_s28  ;;  %s190_s6 = int_to_ptr.hbm [resolvable:$true] %s189_s6 }
   0xb   : > { %p1137_p3 = pnand %p757_p0, %p164_p2  ;;  %s1070_s8 = smov [#allocation7]  }
   0xc   : > { %s191_s9 = sshll.u32 %s1070_s8, 4  ;;  %s1071_s10 = smov 256   ;;  %s192_s9 = int_to_ptr.vmem [resolvable:$true] %s191_s9 }
   0xd   : > { %p793_p4 = pneg %p1137_p3  ;;  %s1072_s11 = smov 16  }
   0xe   : > { %s1073_s12 = smov 32   ;;  %s1074_s13 = smov 2  }
   0xf   : > { %p1149_p6 = pnand %p793_p4, %p44_p1  ;;  %s203_s16 = sshll.u32 %s1295_s3, 4  ;;  %s204_s16 = int_to_ptr.hbm [resolvable:$true] %s203_s16 }
  0x10   : > { %s1075_s17 = smov [#allocation8]   ;;  %s1076_s23 = smov 128  }
  0x11   : > { %796 = dma.hbm_to_vmem [thread:$0]  (!%p1149_p6), %s176_s24, 12288, %s178_s28, [#allocation6], %s1071_s10, %s1071_s10, %s1072_s11  }
  0x12   : > { %799 = dma.hbm_to_vmem [thread:$0]  (!%p1149_p6), %s190_s6, 96, %s192_s9, [#allocation6], %s1073_s12, %s1073_s12, %s1074_s13  }
  0x13   : > { %s205_s22 = sshll.u32 %s1075_s17, 4  ;;  %s1077_s24 = smov 8   ;;  %s206_s22 = int_to_ptr.vmem [resolvable:$true] %s205_s22 }
  0x14   : > { %802 = dma.hbm_to_vmem [thread:$0]  (!%p1149_p6), %s204_s16, 2048, %s206_s22, [#allocation9], %s1076_s23, %s1076_s23, %s1077_s24  }
  0x15   : > { %s756_s27 = sadd.s32 4294967294, %s1067_s21   ;;  %s1164_s28 = sadd.s32 1, %s1067_s21  }
  0x16   : > { %s30_s29 = sadd.s32 1, %s1063_s20  ;;  %s27_s30 = ssub.s32 %s1067_s21, %s1164_s28 }
  0x17   : > { %p37_p7 = scmp.ne.s32.totalorder %s1063_s20, %s1059_s19  ;;  %p28_p8 = scmp.eq.s32.totalorder %s27_s30, 0 }
  0x18   : > { %p38_p9 = scmp.eq.s32.totalorder %s1067_s21, 0  ;;  %p43_p10 = scmp.ne.s32.totalorder %s1059_s19, %s1055_s18 }
  0x19   : > { %p151_p11 = scmp.eq.s32.totalorder %s1132_s25, 1  ;;  %p157_p0 = scmp.eq.s32.totalorder %s756_s27, 1 }
  0x1a   : > { %s1176_s6 = scalar_select %p28_p8, %s1063_s20, %s30_s29  }
  0x1b   : > { %p1180_p12 = por %p44_p1, %p43_p10  ;;  %p1184_p13 = por %p151_p11, %p37_p7 }
  0x1c   : > { %p39_p2 = por %p38_p9, %p37_p7  ;;  %s222_s9 = sand.u32 1, %s1063_s20  }
  0x1d   : > { %p1189_p4 = por %p157_p0, %p43_p10  ;;  %p814_p6 = scmp.lt.s32.totalorder %s1067_s21, 2 }
  0x1e   : > { %s762_s11 = sshll.u32 %s222_s9, 3  ;;  %s763_s12 = sshll.u32 %s1067_s21, 3 }
  0x1f   : > { %s230_s15 = scalar_lea.hbm %s1292_s0, %s763_s12  ;;  %s226_s17 = scalar_lea.vmem [#allocation2], %s762_s11 }
  0x20   : > { %s232_s16 = sshll.u32 %s230_s15, 4  ;;  %s234_s22 = sshll.u32 %s226_s17, 4  ;;  %s233_s16 = int_to_ptr.hbm [resolvable:$true] %s232_s16  ;;  %s235_s22 = int_to_ptr.vmem [resolvable:$true] %s234_s22 }
  0x21   : > { %p1198_p8 = pnand %p814_p6, %p39_p2  ;;  %s223_s24 = scalar_lea.sflag [#allocation3], %s222_s9 }
  0x22   : > { %s963_s27 = sshra.s32 %s233_s16, 4  ;;  %s970_s11 = scalar_lea.hbm %s1292_s0, 16  ;;  %s964_s27 = int_to_ptr.hbm [resolvable:$true] %s963_s27 }
  0x23   : > { %s965_s29 = scalar_lea.hbm %s964_s27, 8  ;;  %p967_p9 = pneg %p1198_p8 }
  0x24   : > { %p966_p7 = scmp.ne.s32.totalorder %s964_s27, %s965_s29  ;;  %p971_p0 = scmp.lt.s32.totalorder %s964_s27, %s1292_s0 }
  0x25   : > { %p972_p2 = scmp.lt.s32.totalorder %s970_s11, %s965_s29 }
  0x26   : > { %p968_p10 = pnand %p967_p9, %p966_p7 }
  0x27   : > { %p973_p6 = por %p972_p2, %p971_p0 }
  0x28   : > { %p969_p11 = pneg %p968_p10 }
  0x2a   : > { %p974_p5 = pnand %p973_p6, %p969_p11 }
  0x2c   : > { %977 = shalt.err (!%p974_p5)
}
  0x2d   : > { %806 = dma.hbm_to_vmem [thread:$0]  (!%p1198_p8), %s233_s16, 128, %s235_s22, %s223_s24  }
  0x2e   : > { %243 = sbr.rel (%p1137_p3) target bundleno = 711 (0x2c7), region = 40  ;;  %s1215_s9 = sand.u32 (!%p1137_p3), 1, %s1059_s19  }
  0x2f   : > { %s765_s15 = sshll.u32 (!%p1137_p3), %s1215_s9, 3  ;;  %s246_s17 = scalar_lea.sflag (!%p1137_p3), [#allocation3], %s1215_s9 }
  0x30   : > { %s1221_s27 = scalar_lea.vmem (!%p1137_p3), [#allocation2], %s765_s15 }
  0x33   : > { %1038 = dma.done.wait (%p1180_p12), %s246_s17, 128  }
  0x34   : > { %1040 = vsyncadd (%p1180_p12), %s246_s17, 4294967168 }
  0x35   : > { %1042 = dma.done.wait (%p44_p1), [#allocation6], 12384  }
  0x36   : > { %1044 = vsyncadd (%p44_p1), [#allocation6], 4294954912 }
  0x37   : > { %1046 = dma.done.wait (%p44_p1), [#allocation9], 2048  }
  0x38   : > { %1048 = vsyncadd (%p44_p1), [#allocation9], 4294965248  ;;  %v323_v0 = vld [vmem:[#allocation5 + $0xf0] sm:$0xff]  ;;  %v321_v1 = vld [vmem:[#allocation5 + $0xe0] sm:$0xff]  ;;  %s774_s26 = sshll.u32 %s1132_s25, 3  ;;  %s291_s29 = scalar_lea.vmem [#allocation10], %s765_s15 }
  0x39   : > { %331 = vmatpush.msra.mxu0 %v323_v0  ;;  %v319_v2 = vld [vmem:[#allocation5 + $0xd0] sm:$0xff]  ;;  %v317_v3 = vld [vmem:[#allocation5 + $0xc0] sm:$0xff]  ;;  %v324_v4 = vld [vmem:[#allocation5 + $0xf8] sm:$0xff]  ;;  %s652_s22 = scalar_lea.hbm %s1297_s5, %s774_s26  ;;  %s654_s30 = sshll.u32 %s291_s29, 4  ;;  %s655_s30 = int_to_ptr.vmem [resolvable:$true] %s654_s30 }
  0x3a   : > { %351 = vmatpush.msra.mxu1 %v324_v4  ;;  %v322_v5 = vld [vmem:[#allocation5 + $0xe8] sm:$0xff]  ;;  %v315_v6 = vld [vmem:[#allocation5 + $0xb0] sm:$0xff]  ;;  %v320_v7 = vld [vmem:[#allocation5 + $0xd8] sm:$0xff]  ;;  %s656_s12 = sshll.u32 %s652_s22, 4  ;;  %s642_s11 = scalar_lea.sflag [#allocation4], %s1215_s9  ;;  %s657_s12 = int_to_ptr.hbm [resolvable:$true] %s656_s12 }
  0x3b   : > { %332 = vmatpush.msra.mxu0 %v321_v1  ;;  %v313_v8 = vld [vmem:[#allocation5 + $0xa0] sm:$0xff]  ;;  %v318_v9 = vld [vmem:[#allocation5 + $0xc8] sm:$0xff]  ;;  %v311_v10 = vld [vmem:[#allocation5 + $0x90] sm:$0xff]  ;;  %s1007_s25 = sshra.s32 %s657_s12, 4  ;;  %s1008_s25 = int_to_ptr.hbm [resolvable:$true] %s1007_s25 }
  0x3c   : > { %352 = vmatpush.msra.mxu1 %v322_v5  ;;  %v316_v11 = vld [vmem:[#allocation5 + $0xb8] sm:$0xff]  ;;  %v309_v12 = vld [vmem:[#allocation5 + $0x80] sm:$0xff]  ;;  %v314_v13 = vld [vmem:[#allocation5 + $0xa8] sm:$0xff]  ;;  %s1009_s13 = scalar_lea.hbm %s1008_s25, 8  ;;  %p1014_p12 = scmp.lt.s32.totalorder %s1008_s25, %s1297_s5 }
  0x3d   : > { %333 = vmatpush.msra.mxu0 %v319_v2  ;;  %v307_v14 = vld [vmem:[#allocation5 + $0x70] sm:$0xff]  ;;  %v312_v15 = vld [vmem:[#allocation5 + $0x98] sm:$0xff]  ;;  %v305_v16 = vld [vmem:[#allocation5 + $0x60] sm:$0xff]  ;;  %p1010_p1 = scmp.ne.s32.totalorder %s1008_s25, %s1009_s13 }
  0x3e   : > { %353 = vmatpush.msra.mxu1 %v320_v7  ;;  %v310_v17 = vld [vmem:[#allocation5 + $0x88] sm:$0xff]  ;;  %v303_v18 = vld [vmem:[#allocation5 + $0x50] sm:$0xff]  ;;  %v308_v19 = vld [vmem:[#allocation5 + $0x78] sm:$0xff] }
  0x3f   : > { %334 = vmatpush.msra.mxu0 %v317_v3  ;;  %v301_v20 = vld [vmem:[#allocation5 + $0x40] sm:$0xff]  ;;  %v306_v21 = vld [vmem:[#allocation5 + $0x68] sm:$0xff]  ;;  %v299_v22 = vld [vmem:[#allocation5 + $0x30] sm:$0xff]  ;;  %p1011_p3 = pnand %p1010_p1, %p1184_p13 }
  0x40   : > { %354 = vmatpush.msra.mxu1 %v318_v9  ;;  %v304_v23 = vld [vmem:[#allocation5 + $0x58] sm:$0xff]  ;;  %v297_v24 = vld [vmem:[#allocation5 + $0x20] sm:$0xff]  ;;  %v302_v25 = vld [vmem:[#allocation5 + $0x48] sm:$0xff] }
  0x41   : > { %335 = vmatpush.msra.mxu0 %v315_v6  ;;  %v295_v26 = vld [vmem:[#allocation5 + $0x10] sm:$0xff]  ;;  %v300_v27 = vld [vmem:[#allocation5 + $0x38] sm:$0xff]  ;;  %v293_v28 = vld [vmem:[#allocation5] sm:$0xff]  ;;  %p1012_p5 = pneg %p1011_p3 }
  0x42   : > { %355 = vmatpush.msra.mxu1 %v316_v11  ;;  %v298_v29 = vld [vmem:[#allocation5 + $0x28] sm:$0xff]  ;;  %v1236_v30 = vld [vmem:[%s1221_s27] sm:$0xff]  ;;  %v423_v35 = vld [vmem:[#allocation5 + $0x1e0] sm:$0xff]  ;;  %s1013_s27 = scalar_lea.hbm %s1297_s5, 16 }
  0x43   : > { %336 = vmatpush.msra.mxu0 %v313_v8  ;;  %v296_v31 = vld [vmem:[#allocation5 + $0x18] sm:$0xff]  ;;  %v294_v32 = vld [vmem:[#allocation5 + $0x8] sm:$0xff]  ;;  %v425_v33 = vld [vmem:[#allocation5 + $0x1f0] sm:$0xff]  ;;  %p1015_p8 = scmp.lt.s32.totalorder %s1013_s27, %s1009_s13 }
  0x44   : > { %356 = vmatpush.msra.mxu1 %v314_v13  ;;  %v426_v34 = vld [vmem:[#allocation5 + $0x1f8] sm:$0xff]  ;;  %434 = vmatpush.msra.mxu2 %v425_v33  ;;  %v424_v36 = vld [vmem:[#allocation5 + $0x1e8] sm:$0xff]  ;;  %v421_v37 = vld [vmem:[#allocation5 + $0x1d0] sm:$0xff] }
  0x45   : > { %337 = vmatpush.msra.mxu0 %v311_v10  ;;  %454 = vmatpush.msra.mxu3 %v426_v34  ;;  %v422_v38 = vld [vmem:[#allocation5 + $0x1d8] sm:$0xff]  ;;  %v419_v39 = vld [vmem:[#allocation5 + $0x1c0] sm:$0xff]  ;;  %v420_v40 = vld [vmem:[#allocation5 + $0x1c8] sm:$0xff]  ;;  %p1016_p7 = por %p1015_p8, %p1014_p12 }
  0x46   : > { %357 = vmatpush.msra.mxu1 %v312_v15  ;;  %435 = vmatpush.msra.mxu2 %v423_v35  ;;  %v417_v41 = vld [vmem:[#allocation5 + $0x1b0] sm:$0xff]  ;;  %v418_v42 = vld [vmem:[#allocation5 + $0x1b8] sm:$0xff]  ;;  %v415_v43 = vld [vmem:[#allocation5 + $0x1a0] sm:$0xff] }
  0x47   : > { %338 = vmatpush.msra.mxu0 %v309_v12  ;;  %455 = vmatpush.msra.mxu3 %v424_v36  ;;  %v416_v44 = vld [vmem:[#allocation5 + $0x1a8] sm:$0xff]  ;;  %v413_v45 = vld [vmem:[#allocation5 + $0x190] sm:$0xff]  ;;  %v414_v46 = vld [vmem:[#allocation5 + $0x198] sm:$0xff]  ;;  %p1017_p9 = pnand %p1016_p7, %p1012_p5 }
  0x48   : > { %358 = vmatpush.msra.mxu1 %v310_v17  ;;  %436 = vmatpush.msra.mxu2 %v421_v37  ;;  %v411_v47 = vld [vmem:[#allocation5 + $0x180] sm:$0xff]  ;;  %v412_v48 = vld [vmem:[#allocation5 + $0x188] sm:$0xff]  ;;  %v409_v49 = vld [vmem:[#allocation5 + $0x170] sm:$0xff] }
  0x49   : > { %339 = vmatpush.msra.mxu0 %v307_v14  ;;  %456 = vmatpush.msra.mxu3 %v422_v38  ;;  %v410_v50 = vld [vmem:[#allocation5 + $0x178] sm:$0xff]  ;;  %v407_v51 = vld [vmem:[#allocation5 + $0x160] sm:$0xff]  ;;  %v408_v52 = vld [vmem:[#allocation5 + $0x168] sm:$0xff] }
  0x4a   : > { %359 = vmatpush.msra.mxu1 %v308_v19  ;;  %437 = vmatpush.msra.mxu2 %v419_v39  ;;  %v405_v53 = vld [vmem:[#allocation5 + $0x150] sm:$0xff]  ;;  %v406_v54 = vld [vmem:[#allocation5 + $0x158] sm:$0xff]  ;;  %v403_v55 = vld [vmem:[#allocation5 + $0x140] sm:$0xff] }
  0x4b   : > { %340 = vmatpush.msra.mxu0 %v305_v16  ;;  %457 = vmatpush.msra.mxu3 %v420_v40  ;;  %v404_v56 = vld [vmem:[#allocation5 + $0x148] sm:$0xff]  ;;  %v325_v57 = vld [vmem:[#allocation7] sm:$0x3]  ;;  %v401_v58 = vld [vmem:[#allocation5 + $0x130] sm:$0xff] }
  0x4c   : > { %360 = vmatpush.msra.mxu1 %v306_v21  ;;  %438 = vmatpush.msra.mxu2 %v417_v41  ;;  %v402_v59 = vld [vmem:[#allocation5 + $0x138] sm:$0xff]  ;;  %v327_v60 = vperm.slane %v325_v57, 0  ;;  %v399_v61 = vld [vmem:[#allocation5 + $0x120] sm:$0xff]  ;;  %v400_v62 = vld [vmem:[#allocation5 + $0x128] sm:$0xff]  ;;  %v328_v8 = vperm.slane %v325_v57, 1 }
  0x4d   : > { %341 = vmatpush.msra.mxu0 %v303_v18  ;;  %458 = vmatpush.msra.mxu3 %v418_v42  ;;  %v397_v63 = vld [vmem:[#allocation5 + $0x110] sm:$0xff]  ;;  %v398_v0 = vld [vmem:[#allocation5 + $0x118] sm:$0xff]  ;;  %v395_v3 = vld [vmem:[#allocation5 + $0x100] sm:$0xff] }
  0x4e   : > { %361 = vmatpush.msra.mxu1 %v304_v23  ;;  %439 = vmatpush.msra.mxu2 %v415_v43  ;;  %v396_v4 = vld [vmem:[#allocation5 + $0x108] sm:$0xff]  ;;  %v521_v34 = vld [vmem:[#allocation5 + $0x2b8] sm:$0xff]  ;;  %v518_v35 = vld [vmem:[#allocation5 + $0x2a0] sm:$0xff] }
  0x4f   : > { %342 = vmatpush.msra.mxu0 %v301_v20  ;;  %459 = vmatpush.msra.mxu3 %v416_v44  ;;  %v523_v33 = vld [vmem:[#allocation5 + $0x2c8] sm:$0xff]  ;;  %v516_v37 = vld [vmem:[#allocation5 + $0x290] sm:$0xff]  ;;  %v517_v38 = vld [vmem:[#allocation5 + $0x298] sm:$0xff] }
  0x50   : > { %362 = vmatpush.msra.mxu1 %v302_v25  ;;  %440 = vmatpush.msra.mxu2 %v413_v45  ;;  %v528_v25 = vld [vmem:[#allocation5 + $0x2f0] sm:$0xff]  ;;  %v519_v36 = vld [vmem:[#allocation5 + $0x2a8] sm:$0xff]  ;;  %v514_v39 = vld [vmem:[#allocation5 + $0x280] sm:$0xff] }
  0x51   : > { %343 = vmatpush.msra.mxu0 %v299_v22  ;;  %460 = vmatpush.msra.mxu3 %v414_v46  ;;  %v515_v40 = vld [vmem:[#allocation5 + $0x288] sm:$0xff]  ;;  %v512_v41 = vld [vmem:[#allocation5 + $0x270] sm:$0xff]  ;;  %v513_v42 = vld [vmem:[#allocation5 + $0x278] sm:$0xff] }
  0x52   : > { %363 = vmatpush.msra.mxu1 %v300_v27  ;;  %441 = vmatpush.msra.mxu2 %v411_v47  ;;  %v526_v27 = vld [vmem:[#allocation5 + $0x2e0] sm:$0xff]  ;;  %v511_v44 = vld [vmem:[#allocation5 + $0x268] sm:$0xff]  ;;  %v508_v45 = vld [vmem:[#allocation5 + $0x250] sm:$0xff] }
  0x53   : > { %344 = vmatpush.msra.mxu0 %v297_v24  ;;  %461 = vmatpush.msra.mxu3 %v412_v48  ;;  %v510_v43 = vld [vmem:[#allocation5 + $0x260] sm:$0xff]  ;;  %v509_v46 = vld [vmem:[#allocation5 + $0x258] sm:$0xff]  ;;  %v507_v48 = vld [vmem:[#allocation5 + $0x248] sm:$0xff] }
  0x54   : > { %364 = vmatpush.msra.mxu1 %v298_v29  ;;  %442 = vmatpush.msra.mxu2 %v409_v49  ;;  %v524_v29 = vld [vmem:[#allocation5 + $0x2d0] sm:$0xff]  ;;  %v506_v47 = vld [vmem:[#allocation5 + $0x240] sm:$0xff] }
  0x55   : > { %345 = vmatpush.msra.mxu0 %v295_v26  ;;  %462 = vmatpush.msra.mxu3 %v410_v50  ;;  %v529_v26 = vld [vmem:[#allocation5 + $0x2f8] sm:$0xff]  ;;  %v428_v49 = vld [vmem:[#allocation7 + $0x2] sm:$0x3]  ;;  %v504_v50 = vld [vmem:[#allocation5 + $0x230] sm:$0xff] }
  0x56   : > { %365 = vmatpush.msra.mxu1 %v296_v31  ;;  %443 = vmatpush.msra.mxu2 %v407_v51  ;;  %v525_v31 = vld [vmem:[#allocation5 + $0x2d8] sm:$0xff] }
  0x57   : > { %346 = vmatpush.msra.mxu0 %v293_v28  ;;  %463 = vmatpush.msra.mxu3 %v408_v52  ;;  %v527_v28 = vld [vmem:[#allocation5 + $0x2e8] sm:$0xff]  ;;  %v505_v51 = vld [vmem:[#allocation5 + $0x238] sm:$0xff]  ;;  %v430_v52 = vperm.slane %v428_v49, 0 }
  0x58   : > { %347 = vmatmul.f32.vlgmr.msra.gmra.mxu0 %v1236_v30  ;;  %366 = vmatpush.msra.mxu1 %v294_v32  ;;  %v522_v32 = vld [vmem:[#allocation5 + $0x2c0] sm:$0xff] }
  0x59   : > { %367 = vmatmul.f32.vlgmr.msra.gmra.mxu1 %v1236_v30  ;;  %444 = vmatpush.msra.mxu2 %v405_v53  ;;  %v502_v53 = vld [vmem:[#allocation5 + $0x220] sm:$0xff] }
  0x5a   : > { %464 = vmatpush.msra.mxu3 %v406_v54  ;;  %537 = vmatpush.msrb.mxu0 %v528_v25  ;;  %v503_v54 = vld [vmem:[#allocation5 + $0x228] sm:$0xff]  ;;  %v607_v25 = vld [vmem:[#allocation8 + $0x38] sm:$0xff] }
  0x5b   : > { %445 = vmatpush.msra.mxu2 %v403_v55  ;;  %557 = vmatpush.msrb.mxu1 %v529_v26  ;;  %v500_v55 = vld [vmem:[#allocation5 + $0x210] sm:$0xff] }
  0x5c   : > { %465 = vmatpush.msra.mxu3 %v404_v56  ;;  %538 = vmatpush.msrb.mxu0 %v526_v27  ;;  %v501_v56 = vld [vmem:[#allocation5 + $0x218] sm:$0xff]  ;;  %v605_v27 = vld [vmem:[#allocation8 + $0x28] sm:$0xff] }
  0x5d   : > { %446 = vmatpush.msra.mxu2 %v401_v58  ;;  %558 = vmatpush.msrb.mxu1 %v527_v28  ;;  %v606_v26 = vld [vmem:[#allocation8 + $0x30] sm:$0xff]  ;;  %v604_v28 = vld [vmem:[#allocation8 + $0x20] sm:$0xff] }
  0x5e   : > { %466 = vmatpush.msra.mxu3 %v402_v59  ;;  %539 = vmatpush.msrb.mxu0 %v524_v29  ;;  %v498_v59 = vld [vmem:[#allocation5 + $0x200] sm:$0xff] }
  0x5f   : > { %447 = vmatpush.msra.mxu2 %v399_v61  ;;  %559 = vmatpush.msrb.mxu1 %v525_v31  ;;  %v531_v29 = vld [vmem:[#allocation7 + $0x4] sm:$0x3] }
  0x60   : > { %467 = vmatpush.msra.mxu3 %v400_v62  ;;  %540 = vmatpush.msrb.mxu0 %v522_v32  ;;  %v603_v31 = vld [vmem:[#allocation8 + $0x18] sm:$0xff]  ;;  %v533_v32 = vperm.slane %v531_v29, 0 }
  0x61   : > { %448 = vmatpush.msra.mxu2 %v397_v63  ;;  %560 = vmatpush.msrb.mxu1 %v523_v33  ;;  %v602_v33 = vld [vmem:[#allocation8 + $0x10] sm:$0xff] }
  0x62   : > { %468 = vmatpush.msra.mxu3 %v398_v0  ;;  %v431_v0 = vperm.slane %v428_v49, 1 }
  0x63   : > { %449 = vmatpush.msra.mxu2 %v395_v3  ;;  %561 = vmatpush.msrb.mxu1 %v521_v34  ;;  %v600_v34 = vld [vmem:[#allocation8] sm:$0xff] }
  0x64   : > { %469 = vmatpush.msra.mxu3 %v396_v4 }
  0x65   : > { %562 = vmatpush.msrb.mxu1 %v519_v36 }
  0x67   : > { %563 = vmatpush.msrb.mxu1 %v517_v38 }
  0x69   : > { %564 = vmatpush.msrb.mxu1 %v515_v40  ;;  %v534_v40 = vperm.slane %v531_v29, 1 }
  0x6b   : > { %565 = vmatpush.msrb.mxu1 %v513_v42 }
  0x6d   : > { %566 = vmatpush.msrb.mxu1 %v511_v44 }
  0x6f   : > { %567 = vmatpush.msrb.mxu1 %v509_v46 }
  0x71   : > { %568 = vmatpush.msrb.mxu1 %v507_v48 }
  0x73   : > { %569 = vmatpush.msrb.mxu1 %v505_v51 }
  0x75   : > { %570 = vmatpush.msrb.mxu1 %v503_v54 }
  0x77   : > { %571 = vmatpush.msrb.mxu1 %v501_v56 }
  0xd5   : > { %v348_v1 = vpop.f32.mrf.mxu0 }
  0xd6   : > { %v349_v2 = vadd.f32 %v348_v1, %v327_v60  ;;  %v368_v9 = vpop.f32.mrf.mxu1  ;;  %v499_v60 = vld [vmem:[#allocation5 + $0x208] sm:$0xff] }
  0xd7   : > { %v369_v10 = vadd.f32 %v368_v9, %v328_v8  ;;  %572 = vmatpush.msrb.mxu1 %v499_v60 }
  0xd8   : > { %v770_v5 = vmul.f32 -1.442695, %v349_v2 }
  0xd9   : > { %v390_v14 = vmax.f32 %v369_v10, 0.0 }
  0xda   : > { %861 = vpow2.f32 %v770_v5 }
  0xdb   : > { %v391_v19 = vsub.f32 %v390_v14, %v1236_v30 }
  0xe0   : > { %v862_v6 = vpop.eup %861 }
  0xe1   : > { %v374_v7 = vadd.f32 1.0, %v862_v6 }
  0xe3   : > { %863 = vrcp.f32 %v374_v7  ;;  %v386_v15 = vand.u32 2147483648, %v374_v7  ;;  %v384_v17 = vand.u32 2147483647, %v374_v7  ;;  %vm380_vm1 = vweird.f32 %v374_v7 }
  0xe5   : > { %v387_v20 = vor.u32 1.1754944e-38, %v386_v15  ;;  %vm385_vm3 = vcmp.eq.f32.partialorder %v384_v17, 8.507059e+37  ;;  %v615_v17 = vld [vmem:[#allocation8 + $0x78] sm:$0xff] }
  0xe6   : > { %620 = vmatpush.msrb.mxu2 %v615_v17 }
  0xe9   : > { %v864_v11 = vpop.eup %863 }
  0xea   : > { %v376_v12 = vmul.f32 %v864_v11, %v374_v7  ;;  %vm381_vm0 = vweird.f32 %v864_v11 }
  0xeb   : > { %vm382_vm2 = vmor %vm380_vm1, %vm381_vm0 }
  0xec   : > { %v377_v13 = vsub.f32 1.0, %v376_v12 }
  0xee   : > { %v378_v16 = vmul.f32 %v864_v11, %v377_v13 }
  0xf0   : > { %v379_v18 = vadd.f32 %v864_v11, %v378_v16 }
  0xf2   : > { %v383_v21 = vsel %vm382_vm2, %v864_v11, %v379_v18  ;;  %v614_v18 = vld [vmem:[#allocation8 + $0x70] sm:$0xff] }
  0xf3   : > { %v388_v22 = vsel %vm385_vm3, %v387_v20, %v383_v21  ;;  %621 = vmatpush.msrb.mxu2 %v614_v18  ;;  %v612_v20 = vld [vmem:[#allocation8 + $0x60] sm:$0xff]  ;;  %v611_v21 = vld [vmem:[#allocation8 + $0x58] sm:$0xff] }
  0xf4   : > { %v392_v23 = vmul.f32 %v391_v19, %v388_v22  ;;  %v613_v19 = vld [vmem:[#allocation8 + $0x68] sm:$0xff]  ;;  %v610_v22 = vld [vmem:[#allocation8 + $0x50] sm:$0xff] }
  0xf5   : > { %622 = vmatpush.msrb.mxu2 %v613_v19 }
  0xf6   : > { %v1242_v24 = vadd.f32 %v392_v23, %v1236_v30  ;;  %v520_v30 = vld [vmem:[#allocation5 + $0x2b0] sm:$0xff] }
  0xf7   : > { %541 = vmatpush.msrb.mxu0 %v520_v30  ;;  %623 = vmatpush.msrb.mxu2 %v612_v20  ;;  %v609_v23 = vld [vmem:[#allocation8 + $0x48] sm:$0xff] }
  0xf8   : > { %450 = vmatmul.f32.vlgmr.msra.gmra.mxu2 %v1242_v24  ;;  %470 = vmatmul.f32.vlgmr.msra.gmra.mxu3 %v1242_v24  ;;  %v601_v30 = vld [vmem:[#allocation8 + $0x8] sm:$0xff] }
  0xf9   : > { %542 = vmatpush.msrb.mxu0 %v518_v35  ;;  %624 = vmatpush.msrb.mxu2 %v611_v21 }
  0xfb   : > { %543 = vmatpush.msrb.mxu0 %v516_v37  ;;  %625 = vmatpush.msrb.mxu2 %v610_v22 }
  0xfd   : > { %544 = vmatpush.msrb.mxu0 %v514_v39  ;;  %626 = vmatpush.msrb.mxu2 %v609_v23 }
  0xff   : > { %545 = vmatpush.msrb.mxu0 %v512_v41 }
 0x101   : > { %546 = vmatpush.msrb.mxu0 %v510_v43 }
 0x103   : > { %547 = vmatpush.msrb.mxu0 %v508_v45 }
 0x105   : > { %548 = vmatpush.msrb.mxu0 %v506_v47 }
 0x107   : > { %549 = vmatpush.msrb.mxu0 %v504_v50 }
 0x109   : > { %550 = vmatpush.msrb.mxu0 %v502_v53 }
 0x10b   : > { %551 = vmatpush.msrb.mxu0 %v500_v55 }
 0x10d   : > { %552 = vmatpush.msrb.mxu0 %v498_v59 }
 0x17b   : > { %v451_v57 = vpop.f32.mrf.mxu2  ;;  %v471_v1 = vpop.f32.mrf.mxu3 }
 0x17c   : > { %v452_v58 = vadd.f32 %v451_v57, %v430_v52  ;;  %v472_v4 = vadd.f32 %v471_v1, %v431_v0  ;;  %v860_v57 = vld [vmem:[%s1296_s4] ss:$0 sm:$0xff] }
 0x17e   : > { %v771_v61 = vmul.f32 -1.442695, %v452_v58  ;;  %v493_v9 = vmax.f32 %v472_v4, 0.0 }
 0x180   : > { %865 = vpow2.f32 %v771_v61  ;;  %v494_v13 = vsub.f32 %v493_v9, %v1242_v24 }
 0x186   : > { %v866_v62 = vpop.eup %865 }
 0x187   : > { %v477_v63 = vadd.f32 1.0, %v866_v62 }
 0x189   : > { %867 = vrcp.f32 %v477_v63  ;;  %v489_v6 = vand.u32 2147483648, %v477_v63  ;;  %v487_v8 = vand.u32 2147483647, %v477_v63  ;;  %vm483_vm5 = vweird.f32 %v477_v63 }
 0x18b   : > { %v490_v11 = vor.u32 1.1754944e-38, %v489_v6  ;;  %vm488_vm7 = vcmp.eq.f32.partialorder %v487_v8, 8.507059e+37 }
 0x18f   : > { %v868_v2 = vpop.eup %867 }
 0x190   : > { %v479_v3 = vmul.f32 %v868_v2, %v477_v63  ;;  %vm484_vm4 = vweird.f32 %v868_v2 }
 0x191   : > { %vm485_vm6 = vmor %vm483_vm5, %vm484_vm4 }
 0x192   : > { %v480_v5 = vsub.f32 1.0, %v479_v3 }
 0x194   : > { %v481_v7 = vmul.f32 %v868_v2, %v480_v5 }
 0x196   : > { %v482_v10 = vadd.f32 %v868_v2, %v481_v7 }
 0x198   : > { %v486_v12 = vsel %vm485_vm6, %v868_v2, %v482_v10 }
 0x199   : > { %v491_v14 = vsel %vm488_vm7, %v490_v11, %v486_v12 }
 0x19a   : > { %v495_v15 = vmul.f32 %v494_v13, %v491_v14 }
 0x19c   : > { %v1248_v16 = vadd.f32 %v495_v15, %v1242_v24  ;;  %v608_v24 = vld [vmem:[#allocation8 + $0x40] sm:$0xff] }
 0x19d   : > { %627 = vmatpush.msrb.mxu2 %v608_v24 }
 0x19e   : > { %553 = vmatmul.f32.vlgmr.msrb.gmra.mxu0 %v1248_v16  ;;  %573 = vmatmul.f32.vlgmr.msrb.gmra.mxu1 %v1248_v16 }
 0x19f   : > { %628 = vmatpush.msrb.mxu2 %v607_v25 }
 0x1a1   : > { %629 = vmatpush.msrb.mxu2 %v606_v26 }
 0x1a3   : > { %630 = vmatpush.msrb.mxu2 %v605_v27 }
 0x1a5   : > { %631 = vmatpush.msrb.mxu2 %v604_v28 }
 0x1a7   : > { %632 = vmatpush.msrb.mxu2 %v603_v31 }
 0x1a9   : > { %633 = vmatpush.msrb.mxu2 %v602_v33 }
 0x1ab   : > { %634 = vmatpush.msrb.mxu2 %v601_v30 }
 0x1ad   : > { %635 = vmatpush.msrb.mxu2 %v600_v34 }
 0x21b   : > { %v554_v35 = vpop.f32.mrf.mxu0  ;;  %v574_v41 = vpop.f32.mrf.mxu1 }
 0x21c   : > { %v555_v36 = vadd.f32 %v554_v35, %v533_v32  ;;  %v575_v44 = vadd.f32 %v574_v41, %v534_v40 }
 0x21e   : > { %v772_v37 = vmul.f32 -1.442695, %v555_v36  ;;  %v596_v49 = vmax.f32 %v575_v44, 0.0 }
 0x220   : > { %869 = vpow2.f32 %v772_v37  ;;  %v597_v53 = vsub.f32 %v596_v49, %v1248_v16 }
 0x226   : > { %v870_v38 = vpop.eup %869 }
 0x227   : > { %v580_v39 = vadd.f32 1.0, %v870_v38 }
 0x229   : > { %871 = vrcp.f32 %v580_v39  ;;  %v592_v46 = vand.u32 2147483648, %v580_v39  ;;  %v590_v48 = vand.u32 2147483647, %v580_v39  ;;  %vm586_vm9 = vweird.f32 %v580_v39 }
 0x22b   : > { %v593_v51 = vor.u32 1.1754944e-38, %v592_v46  ;;  %vm591_vm11 = vcmp.eq.f32.partialorder %v590_v48, 8.507059e+37 }
 0x22f   : > { %v872_v42 = vpop.eup %871 }
 0x230   : > { %v582_v43 = vmul.f32 %v872_v42, %v580_v39  ;;  %vm587_vm8 = vweird.f32 %v872_v42 }
 0x231   : > { %vm588_vm10 = vmor %vm586_vm9, %vm587_vm8 }
 0x232   : > { %v583_v45 = vsub.f32 1.0, %v582_v43 }
 0x234   : > { %v584_v47 = vmul.f32 %v872_v42, %v583_v45 }
 0x236   : > { %v585_v50 = vadd.f32 %v872_v42, %v584_v47 }
 0x238   : > { %v589_v52 = vsel %vm588_vm10, %v872_v42, %v585_v50 }
 0x239   : > { %v594_v54 = vsel %vm591_vm11, %v593_v51, %v589_v52 }
 0x23a   : > { %v598_v55 = vmul.f32 %v597_v53, %v594_v54 }
 0x23c   : > { %v599_v56 = vadd.f32 %v598_v55, %v1248_v16 }
 0x23e   : > { %636 = vmatmul.f32.vlgmr.msrb.gmra.mxu2 %v599_v56 }
 0x2c1   : > { %v637_v58 = vpop.f32.mrf.mxu2 }
 0x2c2   : > { %v638_v59 = vadd.f32 %v860_v57, %v637_v58 }
 0x2c4   : > { %640 = vst [vmem:[%s291_s29] sm:$0xff] %v638_v59 }
 0x2c5   : > { %1020 = shalt.err (!%p1017_p9)
}
 0x2c6   : > { %791 = dma.vmem_to_hbm [thread:$0]  (%p1184_p13), %s655_s30, 128, %s657_s12, %s642_s11  }
 0x2c7 PF: > { %s668_s9 = sand.u32 1, %s1055_s18   ;;  %p1304_p10 = scmp.ge.s32.totalorder %s1067_s21, 2 }
 0x2c8   : > { %s669_s7 = scalar_lea.sflag [#allocation4], %s668_s9 }
 0x2c9   : > { %p808_p11 = pnand %p1304_p10, %p1189_p4 }
 0x2cb   : > { %p809_p0 = pneg %p808_p11 }
 0x2cd   : > { %1050 = dma.done.wait (%p809_p0), %s669_s7, 128  }
 0x2ce   : > { %1052 = vsyncadd (%p809_p0), %s669_s7, 4294967168  ;;  %p20_p2 = scmp.ge.s32.totalorder %s1164_s28, 4   ;;  %s1305_s18 = smov %s1059_s19 }
 0x2cf   : > { %s1306_s19 = smov %s1063_s20  ;;  %s1307_s20 = smov %s1176_s6 }
 0x2d0   : > { %s1308_s21 = smov %s1164_s28  ;;  %22 = sbr.rel (!%p20_p2) target bundleno = 7 (0x7), region = 101 }
 0x2d5   :  { %675 = vsyncpa [#allocation3], 1 }
 0x2d6   :  { %677 = vsyncpa [#allocation3 + $0x1], 1 }
 0x2d7   :  { %678 = vsyncpa [#allocation6], 1 }
 0x2d8   :  { %679 = vsyncpa [#allocation9], 1 }
 0x2d9   :  { %680 = vsyncpa [#allocation4], 1 }
 0x2da   :  { %682 = vsyncpa [#allocation4 + $0x1], 1 }

</bundles_post_ra>
